<compile_context>
chip_gen: v7x
topology: tpu7x:2x2x1
jax: 0.10.0
libtpu: 0.0.40
codegen_flags: <defaults>
</compile_context>

<pallas_src>
import jax
import jax.numpy as jnp
from jax import lax
from jax.experimental import pallas as pl
from jax.experimental.pallas import tpu as pltpu


def _logistic_kernel(xp_ref, a_ref, b_ref, o_ref):
    xp = xp_ref[...]                                   # (TR, 128) packed: 32 samples/row
    # One lane-dense MXU matmul: logits for all 3 classes, replicated per 4-lane group.
    la = jnp.dot(xp, a_ref[...], preferred_element_type=jnp.float32) + b_ref[...]
    l0 = la[:, 0:128]                                  # class-0 logits (all lanes valid)
    l1 = la[:, 128:256]
    l2 = la[:, 256:384]
    # Numerically stable softmax over the 3 classes -- purely elementwise (VPU/EUP).
    m = jnp.maximum(jnp.maximum(l0, l1), l2)
    e0 = jnp.exp(l0 - m)
    e1 = jnp.exp(l1 - m)
    e2 = jnp.exp(l2 - m)
    inv = pl.reciprocal(e0 + e1 + e2, approx=True)     # EUP slot; approx=False for exact sums
    # Re-interleave into the packed (B, 4) row-major layout: lane 4s+j holds p_j(sample s).
    phase = lax.broadcasted_iota(jnp.int32, xp.shape, 1) & 3
    out = jnp.where(phase == 0, e0 * inv,
          jnp.where(phase == 1, e1 * inv,
          jnp.where(phase == 2, e2 * inv, 0.0)))
    o_ref[...] = out.astype(o_ref.dtype)


def prepare_params(weight, bias):
    """One-time param prep (module init, not per call).

    weight: (3, 4) torch-layout Linear weight, bias: (3,).
    Returns a_mat (128, 384) and b_row (1, 384):
      a_mat[l, j*128 + c] = weight[j, l % 4] if (l // 4 == c // 4) else 0
      b_row[0, j*128 + c] = bias[j]
    """
    out_f, in_f = weight.shape
    assert (out_f, in_f) == (3, 4)
    lanes = jnp.arange(128)
    group_match = ((lanes[:, None] // 4) == (lanes[None, :] // 4)).astype(jnp.float32)
    w_rep = weight[:, lanes % 4]                                   # (3, 128): W[j, l%4]
    a_planes = w_rep[:, :, None] * group_match[None, :, :]         # (3, 128, 128) [j, l, c]
    a_mat = jnp.transpose(a_planes, (1, 0, 2)).reshape(128, 3 * 128)
    b_row = jnp.broadcast_to(bias[:, None], (3, 128)).reshape(1, 3 * 128)
    return a_mat, b_row


def logistic_forward(x, a_mat, b_row, *, block_rows=2048):
    """Forward pass: x (B, 4) f32  ->  softmax(x @ W.T + b) of shape (B, 3)."""
    B, in_f = x.shape
    assert in_f == 4
    OUT = 3

    # ---- pack: (B, 4) row-major -> (R, 128); free reshape when B % 32 == 0 ----
    b_align = pl.cdiv(B, 32) * 32
    if b_align != B:
        # Only a <32-row alignment pad (never tile-sized); common batch sizes skip it.
        x = jnp.pad(x, ((0, b_align - B), (0, 0)))
    R = b_align // 32
    xp = x.reshape(R, 128)

    # ---- packed-row tile: big enough to amortize ~0.35us/step, 8-sublane aligned ----
    if R <= block_rows:
        tr, grid_n = R, 1
    else:
        grid_n = pl.cdiv(R, block_rows)
        tr = ((pl.cdiv(R, grid_n) + 7) // 8) * 8
    padded_r = grid_n * tr
    if padded_r != R:
        xp = jnp.pad(xp, ((0, padded_r - R), (0, 0)))   # at most a few packed rows

    cost = pl.CostEstimate(
        flops=padded_r * (2 * 128 * 384 + 128 * 12),
        transcendentals=padded_r * 128 * 4,
        bytes_accessed=2 * padded_r * 128 * 4 + (128 * 384 + 384) * 4,
    )

    outp = pl.pallas_call(
        _logistic_kernel,
        out_shape=jax.ShapeDtypeStruct((padded_r, 128), jnp.float32),
        grid_spec=pl.GridSpec(
            grid=(grid_n,),
            in_specs=[
                pl.BlockSpec((tr, 128), lambda i: (i, 0)),        # stream packed x
                pl.BlockSpec((128, 3 * 128), lambda i: (0, 0)),   # a_mat pinned in VMEM
                pl.BlockSpec((1, 3 * 128), lambda i: (0, 0)),     # bias row pinned in VMEM
            ],
            out_specs=pl.BlockSpec((tr, 128), lambda i: (i, 0)),  # lane-dense output
        ),
        compiler_params=pltpu.CompilerParams(
            dimension_semantics=("parallel",),        # shard batch tiles across TCs on v7x
            vmem_limit_bytes=32 * 1024 * 1024,        # explicit scoped-VMEM budget (all gens)
        ),
        cost_estimate=cost,
    )(xp, a_mat, b_row)

    # ---- unpack: (padded_R, 128) -> (B, 3) ----
    return outp[:R].reshape(b_align, 4)[:B, :OUT]


if __name__ == "__main__":
    key = jax.random.PRNGKey(0)
    k_x1, k_x2, k_w, k_b = jax.random.split(key, 4)

    IN, OUT = 4, 3
    bound = 1.0 / jnp.sqrt(IN)
    weight = jax.random.uniform(k_w, (OUT, IN), jnp.float32, -bound, bound)  # torch layout
    bias = jax.random.uniform(k_b, (OUT,), jnp.float32, -bound, bound)
    a_mat, b_row = prepare_params(weight, bias)

    def ref(x):
        return jax.nn.softmax(x @ weight.T + bias, axis=1)

    # Case 1: aligned batch, small tile forced so the streaming grid (2 steps) is exercised.
    B1 = 2048
    x1 = jax.random.normal(k_x1, (B1, IN), jnp.float32)
    out1 = jax.block_until_ready(logistic_forward(x1, a_mat, b_row, block_rows=32))
    assert out1.shape == (B1, OUT)
    assert jnp.allclose(out1, ref(x1), atol=5e-3, rtol=5e-3)
    assert jnp.allclose(jnp.sum(out1, axis=1), jnp.ones((B1,)), atol=5e-3)

    # Case 2: unaligned batch (tail-pad path), default tile, single grid step.
    B2 = 50
    x2 = jax.random.normal(k_x2, (B2, IN), jnp.float32)
    out2 = jax.block_until_ready(logistic_forward(x2, a_mat, b_row))
    assert out2.shape == (B2, OUT)
    assert jnp.allclose(out2, ref(x2), atol=5e-3, rtol=5e-3)

    print("KERNEL_OK")
</pallas_src>

<mosaic_0001>
module attributes {stable_mosaic.version = 11 : i64} {
  func.func @_logistic_kernel(%arg0: i32, %arg1: memref<32x128xf32, #tpu.memory_space<vmem>>, %arg2: memref<128x384xf32, #tpu.memory_space<vmem>>, %arg3: memref<1x384xf32, #tpu.memory_space<vmem>>, %arg4: memref<32x128xf32, #tpu.memory_space<vmem>>) attributes {dimension_semantics = [#tpu.dimension_semantics<parallel>], iteration_bounds = array<i64: 2>, scalar_prefetch = 0 : i64, scratch_operands = 0 : i64, tpu.core_type = #tpu.core_type<tc>, window_params = [{transform_indices = @transform_0, window_bounds = array<i64: 32, 128>}, {pipeline_mode = #tpu.pipeline_mode<synchronous>, transform_indices = @transform_1, window_bounds = array<i64: 128, 384>}, {pipeline_mode = #tpu.pipeline_mode<synchronous>, transform_indices = @transform_2, window_bounds = array<i64: 1, 384>}, {transform_indices = @transform_3, window_bounds = array<i64: 32, 128>}]} {
    %c0 = arith.constant 0 : index
    %c0_0 = arith.constant 0 : index
    %0 = vector.load %arg1[%c0, %c0_0] : memref<32x128xf32, #tpu.memory_space<vmem>>, vector<32x128xf32>
    %c0_1 = arith.constant 0 : index
    %c0_2 = arith.constant 0 : index
    %1 = vector.load %arg2[%c0_1, %c0_2] : memref<128x384xf32, #tpu.memory_space<vmem>>, vector<128x384xf32>
    %cst = arith.constant dense<0.000000e+00> : vector<32x384xf32>
    %2 = tpu.matmul %0, %1, %cst {dimension_numbers = #tpu.dot_dimension_numbers<[1], [0], [0], [1], [0, 0, 1, 1], [], []>} : vector<32x128xf32>, vector<128x384xf32>, vector<32x384xf32> -> vector<32x384xf32>
    %c0_3 = arith.constant 0 : index
    %c0_4 = arith.constant 0 : index
    %3 = vector.load %arg3[%c0_3, %c0_4] : memref<1x384xf32, #tpu.memory_space<vmem>>, vector<1x384xf32>
    %4 = vector.broadcast %3 : vector<1x384xf32> to vector<32x384xf32>
    %5 = arith.addf %2, %4 : vector<32x384xf32>
    %6 = vector.extract_strided_slice %5 {offsets = [0, 0], sizes = [32, 128], strides = [1, 1]} : vector<32x384xf32> to vector<32x128xf32>
    %7 = vector.extract_strided_slice %5 {offsets = [0, 128], sizes = [32, 128], strides = [1, 1]} : vector<32x384xf32> to vector<32x128xf32>
    %8 = vector.extract_strided_slice %5 {offsets = [0, 256], sizes = [32, 128], strides = [1, 1]} : vector<32x384xf32> to vector<32x128xf32>
    %9 = arith.maximumf %6, %7 : vector<32x128xf32>
    %10 = arith.maximumf %9, %8 : vector<32x128xf32>
    %11 = arith.subf %6, %10 : vector<32x128xf32>
    %12 = math.exp %11 : vector<32x128xf32>
    %13 = arith.subf %7, %10 : vector<32x128xf32>
    %14 = math.exp %13 : vector<32x128xf32>
    %15 = arith.subf %8, %10 : vector<32x128xf32>
    %16 = math.exp %15 : vector<32x128xf32>
    %17 = arith.addf %12, %14 : vector<32x128xf32>
    %18 = arith.addf %17, %16 : vector<32x128xf32>
    %19 = tpu.reciprocal %18 {approx = true} : vector<32x128xf32> -> vector<32x128xf32>
    %20 = tpu.iota {dimensions = array<i32: 1>} : vector<32x128xi32>
    %c3_i32 = arith.constant 3 : i32
    %21 = vector.broadcast %c3_i32 : i32 to vector<32x128xi32>
    %22 = arith.andi %20, %21 : vector<32x128xi32>
    %c0_i32 = arith.constant 0 : i32
    %23 = vector.broadcast %c0_i32 : i32 to vector<32x128xi32>
    %24 = arith.cmpi eq, %22, %23 : vector<32x128xi32>
    %25 = arith.mulf %12, %19 : vector<32x128xf32>
    %c1_i32 = arith.constant 1 : i32
    %26 = vector.broadcast %c1_i32 : i32 to vector<32x128xi32>
    %27 = arith.cmpi eq, %22, %26 : vector<32x128xi32>
    %28 = arith.mulf %14, %19 : vector<32x128xf32>
    %c2_i32 = arith.constant 2 : i32
    %29 = vector.broadcast %c2_i32 : i32 to vector<32x128xi32>
    %30 = arith.cmpi eq, %22, %29 : vector<32x128xi32>
    %31 = arith.mulf %16, %19 : vector<32x128xf32>
    %cst_5 = arith.constant 0.000000e+00 : f32
    %32 = vector.broadcast %cst_5 : f32 to vector<32x128xf32>
    %33 = arith.select %30, %31, %32 : vector<32x128xi1>, vector<32x128xf32>
    %34 = arith.select %27, %28, %33 : vector<32x128xi1>, vector<32x128xf32>
    %35 = arith.select %24, %25, %34 : vector<32x128xi1>, vector<32x128xf32>
    %c0_6 = arith.constant 0 : index
    %c0_7 = arith.constant 0 : index
    %36 = vector.load %arg4[%c0_6, %c0_7] : memref<32x128xf32, #tpu.memory_space<vmem>>, vector<32x128xf32>
    tpu.vector_store %arg4[%c0_6, %c0_7], %35 {strides = array<i32>} : memref<32x128xf32, #tpu.memory_space<vmem>>, vector<32x128xf32>,
    return
  }
  func.func @transform_0(%arg0: i32) -> (i32, i32) {
    %c0_i32 = arith.constant 0 : i32
    %c0_i32_0 = arith.constant 0 : i32
    return %arg0, %c0_i32 : i32, i32
  }
  func.func @transform_1(%arg0: i32) -> (i32, i32) {
    %c0_i32 = arith.constant 0 : i32
    %c0_i32_0 = arith.constant 0 : i32
    %c0_i32_1 = arith.constant 0 : i32
    return %c0_i32, %c0_i32_0 : i32, i32
  }
  func.func @transform_2(%arg0: i32) -> (i32, i32) {
    %c0_i32 = arith.constant 0 : i32
    %c0_i32_0 = arith.constant 0 : i32
    %c0_i32_1 = arith.constant 0 : i32
    return %c0_i32, %c0_i32_0 : i32, i32
  }
  func.func @transform_3(%arg0: i32) -> (i32, i32) {
    %c0_i32 = arith.constant 0 : i32
    %c0_i32_0 = arith.constant 0 : i32
    return %arg0, %c0_i32 : i32, i32
  }
}

</mosaic_0001>

<bundles_post_ra>
// kernel: tpu_custom_call.1
= control target key start
LH: loop header
LB: loop body
LE: loop exit
PB: predicated region body
PF: predicated region fallthrough
CT: control target
= control target key end

     0   :  { %8 = vsyncpa [#allocation3], 0  ;;  %s1264_s0 = inlined_call_operand.hbm [shape: f32[64,128], index: 0, kind: input, shape index: {}]   ;;  %s1265_s1 = inlined_call_operand.hbm [shape: f32[128,384], index: 1, kind: input, shape index: {}]   ;;  %s1266_s2 = inlined_call_operand.vmem [shape: f32[1,384], index: 2, kind: input, shape index: {}]   ;;  %s1267_s3 = inlined_call_operand.hbm [shape: f32[64,128], index: 3, kind: output, shape index: {}]  }
   0x1   :  { %10 = vsyncpa [#allocation3 + $0x1], 0 }
   0x2   :  { %11 = vsyncpa [#allocation6], 0 }
   0x3   :  { %12 = vsyncpa [#allocation4], 0 }
   0x4   :  { %14 = vsyncpa [#allocation4 + $0x1], 0  ;;  %s1032_s12 = smov 0   ;;  %s1034_s13 = smov 0  }
   0x5   :  { %s1036_s14 = smov 0   ;;  %s1038_s15 = smov 0  }
   0x6 LB: > { %s1053_s16 = sadd.s32 4294967295, %s1000_s15   ;;  %s636_s17 = sadd.s32 4294967294, %s1000_s15   ;;  %s1000_s15 = sphi %s1038_s15, %s1287_s15   ;;  %s996_s14 = sphi %s1036_s14, %s1286_s14   ;;  %s992_s13 = sphi %s1034_s13, %s1285_s13   ;;  %s988_s12 = sphi %s1032_s12, %s1284_s12  }
   0x7   : > { %p40_p0 = scmp.ne.s32.totalorder %s992_s13, %s988_s12  ;;  %p1268_p1 = scmp.eq.s32.totalorder %s1053_s16, 0 }
   0x8   : > { %p112_p3 = scmp.eq.s32.totalorder %s636_s17, 1  ;;  %p637_p5 = scmp.ge.s32.totalorder %s1000_s15, 1 }
   0x9   : > { %p1062_p4 = por %p1268_p1, %p40_p0  ;;  %p119_p7 = scmp.lt.s32.totalorder %s1000_s15, 3 }
   0xa   : > { %p1067_p6 = por %p112_p3, %p40_p0  ;;  %s1002_s21 = smov [#allocation5]  }
   0xb   : > { %s1271_s18 = scalar_select %p1062_p4, 1, 0 }
   0xc   : > { %s1272_s19 = scalar_select %p1067_p6, 1, 0 }
   0xd   : > { %p1072_p8 = pnand %p637_p5, %p119_p7  ;;  %s131_s22 = sshll.u32 %s1002_s21, 4  ;;  %s1076_s22 = int_to_ptr.vmem [resolvable:$true] %s131_s22 }
   0xe   : > { %s1088_s24 = sadd.s32 1, %s1000_s15   ;;  %s27_s25 = sadd.s32 1, %s996_s14 }
   0xf   : > { %s1273_s20 = scalar_select %p1072_p8, 1, 0 }
  0x10   : > { %p784_p9 = pneg %p1072_p8  ;;  %s24_s26 = ssub.s32 %s1000_s15, %s1088_s24 }
  0x11   : > { %s872_s29 = scalar_lea.hbm %s1265_s1, 6144 }
  0x12   : > { %p1083_p11 = pnand %p784_p9, %p1268_p1  ;;  %p873_p12 = scmp.ne.s32.totalorder %s1265_s1, %s872_s29 }
  0x13   : > { %p879_p5 = scmp.lt.u32.totalorder %s872_s29, %s1265_s1 }
  0x14   : > { %p874_p13 = pneg %p1083_p11 }
  0x16   : > { %p875_p0 = pnand %p874_p13, %p873_p12 }
  0x18   : > { %p876_p3 = pneg %p875_p0 }
  0x1a   : > { %p881_p7 = pnand %p879_p5, %p876_p3 }
  0x1c   : > { %884 = shalt.err (!%p881_p7)
}
  0x1d   : > { %s885_s7 = scalar_lea.vmem %s1076_s22, 6144  ;;  %p893_p2 = scmp.lt.s32.totalorder %s1076_s22, %s1076_s22 }
  0x1e   : > { %p886_p9 = scmp.ne.s32.totalorder %s1076_s22, %s885_s7  ;;  %p894_p6 = scmp.lt.s32.totalorder %s885_s7, %s885_s7 }
  0x20   : > { %p888_p10 = pnand %p886_p9, %p874_p13  ;;  %p895_p4 = por %p894_p6, %p893_p2 }
  0x22   : > { %p889_p1 = pneg %p888_p10 }
  0x24   : > { %p896_p8 = pnand %p895_p4, %p889_p1 }
  0x26   : > { %899 = shalt.err (!%p896_p8)
}
  0x27   : > { %s1003_s8 = smov 384   ;;  %s1004_s9 = smov 24  }
  0x28   : > { %787 = dma.hbm_to_vmem [thread:$0]  (!%p1083_p11), %s1265_s1, 6144, %s1076_s22, [#allocation6], %s1003_s8, %s1003_s8, %s1004_s9  }
  0x29   : > { %p25_p2 = scmp.eq.s32.totalorder %s24_s26, 0  ;;  %p34_p1 = scmp.ne.s32.totalorder %s996_s14, %s992_s13 }
  0x2a   : > { %p35_p4 = scmp.eq.s32.totalorder %s1000_s15, 0  ;;  %p797_p6 = scmp.lt.s32.totalorder %s1000_s15, 2 }
  0x2b   : > { %s1119_s17 = scalar_select %p25_p2, %s996_s14, %s27_s25  }
  0x2c   : > { %p36_p8 = por %p35_p4, %p34_p1  ;;  %p1275_p10 = scmp.eq.s32.totalorder %s1053_s16, 1 }
  0x2d   : > { %s148_s27 = sand.u32 1, %s996_s14   ;;  %s652_s28 = sshll.u32 %s1000_s15, 9 }
  0x2e   : > { %p1123_p12 = por %p1275_p10, %p34_p1  ;;  %s640_s29 = sshll.u32 %s148_s27, 5 }
  0x2f   : > { %s1132_s4 = scalar_lea.hbm %s1264_s0, %s652_s28  ;;  %s152_s22 = scalar_lea.vmem [#allocation2], %s640_s29 }
  0x30   : > { %s159_s25 = sshll.u32 %s152_s22, 4  ;;  %p1134_p11 = pnand %p797_p6, %p36_p8  ;;  %s1138_s25 = int_to_ptr.vmem [resolvable:$true] %s159_s25 }
  0x31   : > { %s1140_s5 = scalar_lea.sflag [#allocation3], %s148_s27  ;;  %s900_s6 = scalar_lea.hbm %s1132_s4, 512 }
  0x32   : > { %p901_p13 = scmp.ne.s32.totalorder %s1132_s4, %s900_s6  ;;  %p902_p0 = pneg %p1134_p11 }
  0x33   : > { %s905_s9 = scalar_lea.hbm %s1264_s0, 1024  ;;  %p906_p7 = scmp.lt.u32.totalorder %s1132_s4, %s1264_s0 }
  0x34   : > { %p903_p3 = pnand %p902_p0, %p901_p13  ;;  %p907_p9 = scmp.lt.u32.totalorder %s905_s9, %s900_s6 }
  0x35   : > { %p909_p1 = scmp.lt.u32.totalorder %s900_s6, %s1132_s4 }
  0x36   : > { %p904_p5 = pneg %p903_p3  ;;  %p908_p2 = por %p907_p9, %p906_p7 }
  0x38   : > { %p910_p4 = por %p909_p1, %p908_p2 }
  0x3a   : > { %p911_p6 = pnand %p910_p4, %p904_p5 }
  0x3c   : > { %914 = shalt.err (!%p911_p6)
}
  0x3d   : > { %s915_s27 = scalar_lea.vmem %s1138_s25, 512  ;;  %s1005_s28 = smov [#allocation2]  }
  0x3e   : > { %p916_p8 = scmp.ne.s32.totalorder %s1138_s25, %s915_s27  ;;  %s920_s29 = sshll.u32 %s1005_s28, 4  ;;  %s921_s29 = int_to_ptr.vmem [resolvable:$false] %s920_s29 }
  0x3f   : > { %s922_s23 = scalar_lea.vmem %s921_s29, 1024  ;;  %p923_p3 = scmp.lt.s32.totalorder %s1138_s25, %s921_s29 }
  0x40   : > { %p918_p10 = pnand %p916_p8, %p902_p0  ;;  %p924_p7 = scmp.lt.s32.totalorder %s922_s23, %s915_s27 }
  0x42   : > { %p919_p13 = pneg %p918_p10  ;;  %p925_p9 = por %p924_p7, %p923_p3 }
  0x44   : > { %p926_p2 = pnand %p925_p9, %p919_p13 }
  0x46   : > { %929 = shalt.err (!%p926_p2)
}
  0x47   : > { %s1006_s30 = smov 128   ;;  %s1007_s22 = smov 8  }
  0x48   : > { %791 = dma.hbm_to_vmem [thread:$0]  (!%p1134_p11), %s1132_s4, 512, %s1138_s25, %s1140_s5, %s1006_s30, %s1006_s30, %s1007_s22  }
  0x49   : > { %p1278_p0 = scmp.ne.s32.totalorder %s1273_s20, 0 }
  0x4a   : > { %s1171_s6 = sand.u32 (!%p1278_p0), 1, %s992_s13   ;;  %p1279_p5 = scmp.ne.s32.totalorder (!%p1278_p0), %s1271_s18, 0 }
  0x4b   : > { %171 = sbr.rel (%p1278_p0) target bundleno = 405 (0x195), region = 32  ;;  %s644_s7 = sshll.u32 (!%p1278_p0), %s1171_s6, 5 }
  0x4c   : > { %s174_s8 = scalar_lea.sflag (!%p1278_p0), [#allocation3], %s1171_s6  ;;  %s1177_s9 = scalar_lea.vmem (!%p1278_p0), [#allocation2], %s644_s7 }
  0x52   : > { %975 = dma.done.wait (%p1279_p5), %s174_s8, 512  }
  0x53   : > { %977 = vsyncadd (%p1279_p5), %s174_s8, 4294966784  ;;  %p1280_p11 = scmp.eq.s32.totalorder %s1053_s16, 0 }
  0x55   : > { %979 = dma.done.wait (%p1280_p11), [#allocation6], 6144   ;;  %p1281_p1 = pmov %p1280_p11 }
  0x56   : > { %v1008_v0 = vmov 0.0   ;;  %v211_v1 = vld [vmem:[#allocation5 + $0x8] sm:$0xff]  ;;  %v214_v2 = vld [vmem:[#allocation5 + $0x20] sm:$0xff]  ;;  %v213_v5 = vld [vmem:[#allocation5 + $0x18] sm:$0xff]  ;;  %s203_s4 = scalar_lea.vmem [#allocation7], %s644_s7  ;;  %s653_s25 = sshll.u32 %s1053_s16, 9 }
  0x57   : > { %981 = vsyncadd (%p1281_p1), [#allocation6], 4294961152  ;;  %339 = vmatprep.mubr.f32.mxu0 %v1008_v0  ;;  %v210_v3 = vld [vmem:[#allocation5] sm:$0xff]  ;;  %v712_v4 = vpack.c.bf16 %v214_v2, %v211_v1  ;;  %v212_v6 = vld [vmem:[#allocation5 + $0x10] sm:$0xff]  ;;  %s553_s26 = sshll.u32 %s203_s4, 4  ;;  %s1216_s11 = scalar_lea.hbm %s1267_s3, %s653_s25  ;;  %s1218_s26 = int_to_ptr.vmem [resolvable:$true] %s553_s26 }
  0x58   : > { %v215_v7 = vld [vmem:[#allocation5 + $0x28] sm:$0xff]  ;;  %v714_v8 = vpack.c.bf16 %v213_v5, %v210_v3  ;;  %v217_v10 = vld [vmem:[#allocation5 + $0x38] sm:$0xff]  ;;  %v220_v11 = vld [vmem:[#allocation5 + $0x50] sm:$0xff]  ;;  %s540_s16 = scalar_lea.sflag [#allocation4], %s1171_s6  ;;  %s930_s27 = scalar_lea.vmem %s1218_s26, 512 }
  0x59   : > { %v744_v9 = vpack.c.bf16 %v215_v7, %v212_v6  ;;  %v216_v12 = vld [vmem:[#allocation5 + $0x30] sm:$0xff]  ;;  %713 = vmatprep.subr.bf16.mxu0 %v712_v4  ;;  %v716_v13 = vpack.c.bf16 %v220_v11, %v217_v10  ;;  %v219_v14 = vld [vmem:[#allocation5 + $0x48] sm:$0xff]  ;;  %v218_v15 = vld [vmem:[#allocation5 + $0x40] sm:$0xff]  ;;  %p931_p4 = scmp.ne.s32.totalorder %s1218_s26, %s930_s27  ;;  %s1009_s28 = smov [#allocation7]  }
  0x5a   : > { %v221_v16 = vld [vmem:[#allocation5 + $0x58] sm:$0xff]  ;;  %715 = vmatpush1.bf16.msra.mxu0 %v714_v8  ;;  %v718_v17 = vpack.c.bf16 %v219_v14, %v216_v12  ;;  %v223_v19 = vld [vmem:[#allocation5 + $0x68] sm:$0xff]  ;;  %v226_v20 = vld [vmem:[#allocation5 + $0x80] sm:$0xff]  ;;  %v260_v14 = vlaneseq  ;;  %s934_s29 = sshll.u32 %s1009_s28, 4  ;;  %s935_s29 = int_to_ptr.vmem [resolvable:$false] %s934_s29 }
  0x5b   : > { %745 = vmatprep.subr.bf16.mxu1 %v744_v9  ;;  %v748_v18 = vpack.c.bf16 %v221_v16, %v218_v15  ;;  %v222_v21 = vld [vmem:[#allocation5 + $0x60] sm:$0xff]  ;;  %717 = vmatprep.subr.bf16.mxu0 %v716_v13  ;;  %v720_v22 = vpack.c.bf16 %v226_v20, %v223_v19  ;;  %v225_v23 = vld [vmem:[#allocation5 + $0x78] sm:$0xff]  ;;  %v224_v24 = vld [vmem:[#allocation5 + $0x70] sm:$0xff]  ;;  %p932_p6 = pnand %p931_p4, %p1123_p12  ;;  %s936_s23 = scalar_lea.vmem %s935_s29, 1024 }
  0x5c   : > { %747 = vmatpush3.bf16.msra.mxu1 %v744_v9  ;;  %v227_v25 = vld [vmem:[#allocation5 + $0x88] sm:$0xff]  ;;  %v229_v27 = vld [vmem:[#allocation5 + $0x98] sm:$0xff]  ;;  %v232_v28 = vld [vmem:[#allocation5 + $0xb0] sm:$0xff]  ;;  %v722_v31 = vpack.c.bf16 %v225_v23, %v222_v21  ;;  %v261_v15 = vshrl.u32 %v260_v14, 7  ;;  %p937_p10 = scmp.lt.s32.totalorder %s1218_s26, %s935_s29  ;;  %p938_p13 = scmp.lt.s32.totalorder %s936_s23, %s930_s27 }
  0x5d   : > { %749 = vmatprep.subr.bf16.mxu1 %v748_v18  ;;  %v752_v26 = vpack.c.bf16 %v227_v25, %v224_v24  ;;  %v230_v29 = vld [vmem:[#allocation5 + $0xa0] sm:$0xff]  ;;  %v233_v30 = vld [vmem:[#allocation5 + $0xb8] sm:$0xff]  ;;  %v724_v32 = vpack.c.bf16 %v232_v28, %v229_v27  ;;  %v228_v33 = vld [vmem:[#allocation5 + $0x90] sm:$0xff]  ;;  %p933_p8 = pneg %p932_p6 }
  0x5e   : > { %719 = vmatpush1.bf16.msra.mxu0 %v718_v17  ;;  %v231_v34 = vld [vmem:[#allocation5 + $0xa8] sm:$0xff]  ;;  %v756_v35 = vpack.c.bf16 %v233_v30, %v230_v29  ;;  %v238_v37 = vld [vmem:[#allocation5 + $0xe0] sm:$0xff]  ;;  %v236_v38 = vld [vmem:[#allocation5 + $0xd0] sm:$0xff]  ;;  %v262_v16 = vsub.s32 0, %v261_v15  ;;  %v270_v19 = vsub.s32 2, %v261_v15  ;;  %p939_p3 = por %p938_p13, %p937_p10 }
  0x5f   : > { %721 = vmatprep.subr.bf16.mxu0 %v720_v22  ;;  %v235_v36 = vld [vmem:[#allocation5 + $0xc8] sm:$0xff]  ;;  %v726_v40 = vpack.c.bf16 %v231_v34, %v228_v33  ;;  %v234_v42 = vld [vmem:[#allocation5 + $0xc0] sm:$0xff]  ;;  %v237_v43 = vld [vmem:[#allocation5 + $0xd8] sm:$0xff] }
  0x60   : > { %751 = vmatpush3.bf16.msra.mxu1 %v748_v18  ;;  %v239_v39 = vld [vmem:[#allocation5 + $0xe8] sm:$0xff]  ;;  %v728_v41 = vpack.c.bf16 %v238_v37, %v235_v36  ;;  %v241_v45 = vld [vmem:[#allocation5 + $0xf8] sm:$0xff]  ;;  %v244_v46 = vld [vmem:[#allocation5 + $0x110] sm:$0xff]  ;;  %v730_v49 = vpack.c.bf16 %v237_v43, %v234_v42  ;;  %v266_v18 = vsub.s32 1, %v261_v15  ;;  %p940_p7 = pnand %p939_p3, %p933_p8 }
  0x61   : > { %753 = vmatprep.subr.bf16.mxu1 %v752_v26  ;;  %v760_v44 = vpack.c.bf16 %v239_v39, %v236_v38  ;;  %v242_v47 = vld [vmem:[#allocation5 + $0x100] sm:$0xff]  ;;  %v245_v48 = vld [vmem:[#allocation5 + $0x118] sm:$0xff]  ;;  %v732_v51 = vpack.c.bf16 %v244_v46, %v241_v45  ;;  %v240_v52 = vld [vmem:[#allocation5 + $0xf0] sm:$0xff] }
  0x62   : > { %723 = vmatpush1.bf16.msra.mxu0 %v722_v31  ;;  %v206_v50 = vld [vmem:[%s1177_s9] sm:$0xff]  ;;  %v243_v53 = vld [vmem:[#allocation5 + $0x108] sm:$0xff]  ;;  %v764_v54 = vpack.c.bf16 %v245_v48, %v242_v47  ;;  %v248_v57 = vld [vmem:[#allocation5 + $0x130] sm:$0xff] }
  0x63   : > { %725 = vmatprep.subr.bf16.mxu0 %v724_v32  ;;  %v247_v55 = vld [vmem:[#allocation5 + $0x128] sm:$0xff]  ;;  %v250_v56 = vld [vmem:[#allocation5 + $0x140] sm:$0xff]  ;;  %706 = vmatprep.mubr.f32.mxu1 %v206_v50  ;;  %v734_v59 = vpack.c.bf16 %v243_v53, %v240_v52  ;;  %v249_v62 = vld [vmem:[#allocation5 + $0x138] sm:$0xff] }
  0x64   : > { %755 = vmatpush3.bf16.msra.mxu1 %v752_v26  ;;  %v251_v58 = vld [vmem:[#allocation5 + $0x148] sm:$0xff]  ;;  %v736_v60 = vpack.c.bf16 %v250_v56, %v247_v55  ;;  %v246_v61 = vld [vmem:[#allocation5 + $0x120] sm:$0xff]  ;;  %v253_v1 = vld [vmem:[#allocation5 + $0x158] sm:$0xff] }
  0x65   : > { %757 = vmatprep.subr.bf16.mxu1 %v756_v35  ;;  %v768_v63 = vpack.c.bf16 %v251_v58, %v248_v57  ;;  %v256_v2 = vld [vmem:[#allocation5 + $0x170] sm:$0xff]  ;;  %v254_v3 = vld [vmem:[#allocation5 + $0x160] sm:$0xff]  ;;  %v257_v4 = vld [vmem:[#allocation5 + $0x178] sm:$0xff]  ;;  %v738_v5 = vpack.c.bf16 %v249_v62, %v246_v61 }
  0x66   : > { %727 = vmatpush1.bf16.msra.mxu0 %v726_v40  ;;  %v740_v6 = vpack.c.bf16 %v256_v2, %v253_v1  ;;  %v252_v7 = vld [vmem:[#allocation5 + $0x150] sm:$0xff]  ;;  %v255_v8 = vld [vmem:[#allocation5 + $0x168] sm:$0xff]  ;;  %v772_v9 = vpack.c.bf16 %v257_v4, %v254_v3  ;;  %v209_v13 = vld [vmem:[%s1177_s9 + $0x18] sm:$0xff] }
  0x67   : > { %729 = vmatprep.subr.bf16.mxu0 %v728_v41  ;;  %v742_v10 = vpack.c.bf16 %v255_v8, %v252_v7  ;;  %v207_v11 = vld [vmem:[%s1177_s9 + $0x8] sm:$0xff]  ;;  %v208_v12 = vld [vmem:[%s1177_s9 + $0x10] sm:$0xff]  ;;  %v258_v17 = vld [vmem:[%s1266_s2] sm:$0x7] }
  0x68   : > { %759 = vmatpush3.bf16.msra.mxu1 %v756_v35  ;;  %v263_v20 = vrot.slane %v258_v17, %v262_v16  ;;  %v267_v21 = vrot.slane %v258_v17, %v266_v18  ;;  %v271_v22 = vrot.slane %v258_v17, %v270_v19 }
  0x69   : > { %761 = vmatprep.subr.bf16.mxu1 %v760_v44 }
  0x6a   : > { %731 = vmatpush1.bf16.msra.mxu0 %v730_v49 }
  0x6b   : > { %733 = vmatprep.subr.bf16.mxu0 %v732_v51 }
  0x6c   : > { %763 = vmatpush3.bf16.msra.mxu1 %v760_v44 }
  0x6d   : > { %765 = vmatprep.subr.bf16.mxu1 %v764_v54 }
  0x6e   : > { %735 = vmatpush1.bf16.msra.mxu0 %v734_v59 }
  0x6f   : > { %737 = vmatprep.subr.bf16.mxu0 %v736_v60 }
  0x70   : > { %767 = vmatpush3.bf16.msra.mxu1 %v764_v54 }
  0x71   : > { %769 = vmatprep.subr.bf16.mxu1 %v768_v63 }
  0x72   : > { %739 = vmatpush1.bf16.msra.mxu0 %v738_v5 }
  0x73   : > { %741 = vmatprep.subr.bf16.mxu0 %v740_v6 }
  0x74   : > { %771 = vmatpush3.bf16.msra.mxu1 %v768_v63 }
  0x75   : > { %773 = vmatprep.subr.bf16.mxu1 %v772_v9 }
  0x76   : > { %743 = vmatpush1.bf16.msra.mxu0 %v742_v10 }
  0x78   : > { %775 = vmatpush3.bf16.msra.mxu1 %v772_v9 }
  0x79   : > { %340 = vmatmul.mubr.f32.vlgmr.msra.gmra.mrb[0].mxu0 %v206_v50 }
  0x7a   : > { %345 = vmatprep.mubr.f32.mxu0 %v1008_v0 }
  0x7b   : > { %707 = vmatmul.mubr.f32.vlgmr.msra.gmra.mrb[0].mxu1 %v207_v11 }
  0x7c   : > { %709 = vmatprep.mubr.f32.mxu1 %v208_v12 }
  0x7d   : > { %346 = vmatmul.mubr.f32.gmra.mrb[2].mxu0 %v207_v11 }
  0x7e   : > { %351 = vmatprep.mubr.f32.mxu0 %v1008_v0 }
  0x7f   : > { %710 = vmatmul.mubr.f32.gmra.mrb[2].mxu1 %v209_v13 }
  0x81   : > { %352 = vmatmul.mubr.f32.gmra.mrb[4].mxu0 %v208_v12 }
  0x82   : > { %357 = vmatprep.mubr.f32.mxu0 %v1008_v0 }
  0x85   : > { %358 = vmatmul.mubr.f32.gmra.mrb[6].mxu0 %v209_v13 }
 0x14c   : > { %v341_v23 = vpop.f32.mrb[0].mxu0 }
 0x14d   : > { %v342_v24 = vadd.f32 %v341_v23, %v263_v20  ;;  %v343_v25 = vpop.f32.mrb[1].mxu0 }
 0x14e   : > { %v708_v26 = vpop.f32.mrb[0].mxu1  ;;  %v344_v27 = vadd.f32 %v343_v25, %v267_v21  ;;  %v506_v25 = vand.u32 127, %v260_v14 }
 0x14f   : > { %v430_v0 = vpop.f32.mrb[1].mxu1  ;;  %v436_v34 = vadd.f32 %v708_v26, %v271_v22 }
 0x150   : > { %v431_v28 = vadd.f32 %v430_v0, %v271_v22  ;;  %v449_v29 = vmax.f32 %v342_v24, %v344_v27  ;;  %v347_v30 = vpop.f32.mrb[2].mxu0 }
 0x151   : > { %v348_v31 = vadd.f32 %v347_v30, %v263_v20  ;;  %v349_v32 = vpop.f32.mrb[3].mxu0  ;;  %v507_v30 = vand.u32 3, %v506_v25 }
 0x152   : > { %v711_v33 = vpop.f32.mrb[2].mxu1  ;;  %v453_v35 = vmax.f32 %v449_v29, %v431_v28  ;;  %v350_v36 = vadd.f32 %v349_v32, %v267_v21 }
 0x153   : > { %v440_v37 = vpop.f32.mrb[3].mxu1  ;;  %v446_v63 = vadd.f32 %v711_v33, %v271_v22  ;;  %vm518_vm0 = vcmp.eq.s32.totalorder %v507_v30, 2  ;;  %vm513_vm1 = vcmp.eq.s32.totalorder %v507_v30, 1  ;;  %vm508_vm2 = vcmp.eq.s32.totalorder %v507_v30, 0 }
 0x154   : > { %v457_v38 = vsub.f32 %v342_v24, %v453_v35  ;;  %v469_v39 = vsub.f32 %v344_v27, %v453_v35  ;;  %v481_v40 = vsub.f32 %v431_v28, %v453_v35  ;;  %v450_v41 = vmax.f32 %v348_v31, %v350_v36  ;;  %v353_v42 = vpop.f32.mrb[4].mxu0 }
 0x155   : > { %v354_v43 = vadd.f32 %v353_v42, %v263_v20  ;;  %v355_v44 = vpop.f32.mrb[5].mxu0  ;;  %v441_v50 = vadd.f32 %v440_v37, %v271_v22 }
 0x156   : > { %v461_v45 = vmul.f32 1.442695, %v457_v38  ;;  %v473_v46 = vmul.f32 1.442695, %v469_v39  ;;  %v454_v47 = vmax.f32 %v450_v41, %v436_v34  ;;  %v485_v48 = vmul.f32 1.442695, %v481_v40 }
 0x157   : > { %v356_v49 = vadd.f32 %v355_v44, %v267_v21 }
 0x158   : > { %840 = vpow2.f32 %v461_v45  ;;  %v458_v51 = vsub.f32 %v348_v31, %v454_v47  ;;  %v470_v52 = vsub.f32 %v350_v36, %v454_v47  ;;  %v482_v53 = vsub.f32 %v436_v34, %v454_v47  ;;  %v359_v54 = vpop.f32.mrb[6].mxu0 }
 0x159   : > { %842 = vpow2.f32 %v473_v46  ;;  %v451_v55 = vmax.f32 %v354_v43, %v356_v49  ;;  %v361_v56 = vpop.f32.mrb[7].mxu0  ;;  %v360_v59 = vadd.f32 %v359_v54, %v263_v20 }
 0x15a   : > { %v463_v57 = vmul.f32 1.442695, %v458_v51  ;;  %v475_v58 = vmul.f32 1.442695, %v470_v52  ;;  %844 = vpow2.f32 %v485_v48  ;;  %v487_v60 = vmul.f32 1.442695, %v482_v53 }
 0x15b   : > { %v455_v61 = vmax.f32 %v451_v55, %v441_v50  ;;  %v362_v62 = vadd.f32 %v361_v56, %v267_v21 }
 0x15c   : > { %846 = vpow2.f32 %v463_v57 }
 0x15d   : > { %848 = vpow2.f32 %v475_v58  ;;  %v459_v1 = vsub.f32 %v354_v43, %v455_v61  ;;  %v471_v2 = vsub.f32 %v356_v49, %v455_v61  ;;  %v483_v3 = vsub.f32 %v441_v50, %v455_v61 }
 0x15e   : > { %v452_v4 = vmax.f32 %v360_v59, %v362_v62  ;;  %850 = vpow2.f32 %v487_v60 }
 0x15f   : > { %v465_v5 = vmul.f32 1.442695, %v459_v1  ;;  %v477_v6 = vmul.f32 1.442695, %v471_v2  ;;  %v489_v7 = vmul.f32 1.442695, %v483_v3 }
 0x160   : > { %v456_v8 = vmax.f32 %v452_v4, %v446_v63 }
 0x161   : > { %852 = vpow2.f32 %v465_v5 }
 0x162   : > { %v841_v9 = vpop.eup %840  ;;  %854 = vpow2.f32 %v477_v6  ;;  %v460_v10 = vsub.f32 %v360_v59, %v456_v8  ;;  %v472_v11 = vsub.f32 %v362_v62, %v456_v8  ;;  %v484_v12 = vsub.f32 %v446_v63, %v456_v8 }
 0x163   : > { %v843_v13 = vpop.eup %842  ;;  %856 = vpow2.f32 %v489_v7 }
 0x164   : > { %v493_v15 = vadd.f32 %v843_v13, %v841_v9  ;;  %v467_v16 = vmul.f32 1.442695, %v460_v10  ;;  %v479_v17 = vmul.f32 1.442695, %v472_v11  ;;  %v845_v18 = vpop.eup %844  ;;  %v491_v19 = vmul.f32 1.442695, %v484_v12 }
 0x166   : > { %v847_v20 = vpop.eup %846  ;;  %v497_v21 = vadd.f32 %v845_v18, %v493_v15  ;;  %858 = vpow2.f32 %v467_v16 }
 0x167   : > { %v849_v22 = vpop.eup %848  ;;  %860 = vpow2.f32 %v479_v17 }
 0x168   : > { %862 = vrcp.f32 %v497_v21  ;;  %v494_v23 = vadd.f32 %v849_v22, %v847_v20  ;;  %v851_v24 = vpop.eup %850 }
 0x169   : > { %864 = vpow2.f32 %v491_v19 }
 0x16a   : > { %v498_v26 = vadd.f32 %v851_v24, %v494_v23 }
 0x16b   : > { %v853_v27 = vpop.eup %852 }
 0x16c   : > { %v855_v0 = vpop.eup %854  ;;  %866 = vrcp.f32 %v498_v26 }
 0x16d   : > { %v495_v28 = vadd.f32 %v855_v0, %v853_v27  ;;  %v857_v29 = vpop.eup %856 }
 0x16f   : > { %v499_v31 = vadd.f32 %v857_v29, %v495_v28 }
 0x170   : > { %v859_v32 = vpop.eup %858 }
 0x171   : > { %v861_v33 = vpop.eup %860  ;;  %868 = vrcp.f32 %v499_v31 }
 0x172   : > { %v863_v34 = vpop.eup %862  ;;  %v496_v35 = vadd.f32 %v861_v33, %v859_v32 }
 0x173   : > { %v865_v36 = vpop.eup %864  ;;  %v509_v37 = vmul.f32 %v863_v34, %v841_v9  ;;  %v514_v38 = vmul.f32 %v863_v34, %v843_v13  ;;  %v519_v14 = vmul.f32 %v863_v34, %v845_v18 }
 0x174   : > { %v500_v39 = vadd.f32 %v865_v36, %v496_v35 }
 0x175   : > { %v523_v40 = vsel %vm518_vm0, %v519_v14, 0.0 }
 0x176   : > { %v867_v41 = vpop.eup %866  ;;  %v527_v42 = vsel %vm513_vm1, %v514_v38, %v523_v40  ;;  %870 = vrcp.f32 %v500_v39 }
 0x177   : > { %v531_v43 = vsel %vm508_vm2, %v509_v37, %v527_v42  ;;  %v510_v44 = vmul.f32 %v867_v41, %v847_v20  ;;  %v515_v45 = vmul.f32 %v867_v41, %v849_v22  ;;  %v520_v46 = vmul.f32 %v867_v41, %v851_v24 }
 0x178   : > { %535 = vst [vmem:[%s203_s4] sm:$0xff] %v531_v43 }
 0x179   : > { %v524_v47 = vsel %vm518_vm0, %v520_v46, 0.0 }
 0x17a   : > { %v528_v48 = vsel %vm513_vm1, %v515_v45, %v524_v47 }
 0x17b   : > { %v869_v49 = vpop.eup %868  ;;  %v532_v50 = vsel %vm508_vm2, %v510_v44, %v528_v48 }
 0x17c   : > { %536 = vst [vmem:[%s203_s4 + $0x8] sm:$0xff] %v532_v50  ;;  %v511_v51 = vmul.f32 %v869_v49, %v853_v27  ;;  %v516_v52 = vmul.f32 %v869_v49, %v855_v0  ;;  %v521_v53 = vmul.f32 %v869_v49, %v857_v29 }
 0x17e   : > { %v525_v54 = vsel %vm518_vm0, %v521_v53, 0.0 }
 0x17f   : > { %v529_v55 = vsel %vm513_vm1, %v516_v52, %v525_v54 }
 0x180   : > { %v871_v56 = vpop.eup %870  ;;  %v533_v57 = vsel %vm508_vm2, %v511_v51, %v529_v55 }
 0x181   : > { %537 = vst [vmem:[%s203_s4 + $0x10] sm:$0xff] %v533_v57  ;;  %v512_v58 = vmul.f32 %v871_v56, %v859_v32  ;;  %v517_v59 = vmul.f32 %v871_v56, %v861_v33  ;;  %v522_v60 = vmul.f32 %v871_v56, %v865_v36 }
 0x183   : > { %v526_v61 = vsel %vm518_vm0, %v522_v60, 0.0 }
 0x184   : > { %v530_v62 = vsel %vm513_vm1, %v517_v59, %v526_v61 }
 0x185   : > { %v534_v63 = vsel %vm508_vm2, %v512_v58, %v530_v62 }
 0x186   : > { %538 = vst [vmem:[%s203_s4 + $0x18] sm:$0xff] %v534_v63 }
 0x187   : > { %943 = shalt.err (!%p940_p7)
}
 0x188   : > { %s944_s30 = scalar_lea.hbm %s1216_s11, 512  ;;  %s948_s8 = scalar_lea.hbm %s1267_s3, 1024 }
 0x189   : > { %p945_p9 = scmp.ne.s32.totalorder %s1216_s11, %s944_s30  ;;  %p949_p5 = scmp.lt.u32.totalorder %s1216_s11, %s1267_s3 }
 0x18a   : > { %p950_p11 = scmp.lt.u32.totalorder %s948_s8, %s944_s30  ;;  %p952_p4 = scmp.lt.u32.totalorder %s944_s30, %s1216_s11 }
 0x18b   : > { %p946_p2 = pnand %p945_p9, %p1123_p12 }
 0x18c   : > { %p951_p1 = por %p950_p11, %p949_p5 }
 0x18d   : > { %p947_p0 = pneg %p946_p2 }
 0x18e   : > { %p953_p6 = por %p952_p4, %p951_p1 }
 0x190   : > { %p954_p8 = pnand %p953_p6, %p947_p0 }
 0x192   : > { %957 = shalt.err (!%p954_p8)
}
 0x193   : > { %s1010_s20 = smov 128   ;;  %s1011_s4 = smov 8  }
 0x194   : > { %782 = dma.vmem_to_hbm [thread:$0]  (%p1123_p12), %s1218_s26, 512, %s1216_s11, %s540_s16, %s1010_s20, %s1010_s20, %s1011_s4  }
 0x195 PF: > { %s568_s25 = sand.u32 1, %s988_s12   ;;  %p1282_p10 = scmp.ne.s32.totalorder %s1272_s19, 0 }
 0x196   : > { %p1283_p13 = scmp.ge.s32.totalorder %s1000_s15, 2  ;;  %s569_s5 = scalar_lea.sflag [#allocation4], %s568_s25 }
 0x198   : > { %p793_p3 = pnand %p1283_p13, %p1282_p10 }
 0x19a   : > { %983 = dma.done.wait (!%p793_p3), %s569_s5, 512  }
 0x19b   : > { %985 = vsyncadd (!%p793_p3), %s569_s5, 4294966784  ;;  %p17_p7 = scmp.ge.s32.totalorder %s1088_s24, 4   ;;  %s1284_s12 = smov %s992_s13 }
 0x19c   : > { %s1285_s13 = smov %s996_s14  ;;  %s1286_s14 = smov %s1119_s17 }
 0x19d   : > { %s1287_s15 = smov %s1088_s24  ;;  %19 = sbr.rel (!%p17_p7) target bundleno = 6 (0x6), region = 81 }
 0x1a4   :  { %574 = vsyncpa [#allocation3], 1 }
 0x1a5   :  { %576 = vsyncpa [#allocation3 + $0x1], 1 }
 0x1a6   :  { %577 = vsyncpa [#allocation6], 1 }
 0x1a7   :  { %578 = vsyncpa [#allocation4], 1 }
 0x1a8   :  { %580 = vsyncpa [#allocation4 + $0x1], 1 }

</bundles_post_ra>
